<compile_context>
chip_gen: v6e
topology: v6e:2x2x1
jax: 0.10.0
libtpu: 0.0.40
codegen_flags: <defaults>
</compile_context>

<pallas_src>
import functools
import math

import jax
import jax.numpy as jnp
from jax.experimental import pallas as pl
from jax.experimental.pallas import tpu as pltpu


_NEG_INF = -1e30  # large finite negative (avoids NaN from (-inf) - (-inf))


def _round_up(a, b):
    return ((a + b - 1) // b) * b


# ---------------------------------------------------------------------------
# Kernel 1: fused QKV projection (single MXU pass, no zero-padded columns).
# ---------------------------------------------------------------------------
def _qkv_proj_kernel(x_ref, w_ref, q_ref, k_ref, v_ref, *, H):
    x = x_ref[...].astype(jnp.bfloat16)          # cast in-kernel (no HBM pass)
    qkv = jnp.dot(x, w_ref[...], preferred_element_type=jnp.float32)
    q_ref[...] = qkv[:, :H].astype(q_ref.dtype)
    k_ref[...] = qkv[:, H:2 * H].astype(k_ref.dtype)
    v_ref[...] = qkv[:, 2 * H:].astype(v_ref.dtype)


def _qkv_projection(x_p, w_qkv, *, H, row_block):
    B, Sp, E = x_p.shape
    out_sds = jax.ShapeDtypeStruct((B, Sp, H), jnp.bfloat16)
    grid_spec = pltpu.PrefetchScalarGridSpec(
        num_scalar_prefetch=0,
        grid=(B, Sp // row_block),
        in_specs=[
            pl.BlockSpec((None, row_block, E), lambda b, r: (b, r, 0)),
            pl.BlockSpec(w_qkv.shape, lambda b, r: (0, 0)),
        ],
        out_specs=[
            pl.BlockSpec((None, row_block, H), lambda b, r: (b, r, 0)),
            pl.BlockSpec((None, row_block, H), lambda b, r: (b, r, 0)),
            pl.BlockSpec((None, row_block, H), lambda b, r: (b, r, 0)),
        ],
    )
    return pl.pallas_call(
        functools.partial(_qkv_proj_kernel, H=H),
        out_shape=(out_sds, out_sds, out_sds),
        grid_spec=grid_spec,
        compiler_params=pltpu.CompilerParams(
            dimension_semantics=("parallel", "parallel"),
            vmem_limit_bytes=32 * 1024 * 1024,
        ),
    )(x_p, w_qkv)


# ---------------------------------------------------------------------------
# Kernel 2: flash attention with online softmax, causal tile skipping,
# DMA-elided skipped tiles, and mask only on diagonal/partial tiles.
# ---------------------------------------------------------------------------
def _flash_attn_kernel(q_ref, k_ref, v_ref, o_ref, m_ref, l_ref, acc_ref, *,
                       q_blk, kv_blk):
    qi = pl.program_id(1)
    ki = pl.program_id(2)
    q_start = qi * q_blk
    kv_start = ki * kv_blk

    @pl.when(ki == 0)
    def _init():
        m_ref[...] = jnp.full_like(m_ref, _NEG_INF)
        l_ref[...] = jnp.zeros_like(l_ref)
        acc_ref[...] = jnp.zeros_like(acc_ref)

    # Causal skip: a KV tile whose first column is past the last row of this
    # Q tile is fully masked -> no MXU / VPU work (its DMA is also elided by
    # the clamped index_map below).
    @pl.when(kv_start < q_start + q_blk)
    def _compute():
        q = q_ref[...]                      # (q_blk, H) bf16 (scale pre-folded)
        k = k_ref[...]                      # (kv_blk, H) bf16
        v = v_ref[...]                      # (kv_blk, H) bf16

        # q @ k^T without materializing a transpose of k.
        s = jax.lax.dot_general(
            q, k, (((1,), (1,)), ((), ())),
            preferred_element_type=jnp.float32)           # (q_blk, kv_blk) f32

        def _online_update(scores):
            m_prev = m_ref[...]
            m_new = jnp.maximum(m_prev, jnp.max(scores, axis=-1, keepdims=True))
            alpha = jnp.exp(m_prev - m_new)
            p = jnp.exp(scores - m_new)
            l_ref[...] = alpha * l_ref[...] + jnp.sum(p, axis=-1, keepdims=True)
            acc_ref[...] = alpha * acc_ref[...] + jnp.dot(
                p.astype(v.dtype), v, preferred_element_type=jnp.float32)
            m_ref[...] = m_new

        # Mask is only needed on tiles touching / crossing the diagonal.
        # Interior tiles (all cols <= all rows) and any tile containing padded
        # key columns paired with valid rows always fall on the masked path.
        is_diagonal = kv_start + kv_blk - 1 > q_start

        @pl.when(is_diagonal)
        def _masked():
            row = q_start + jax.lax.broadcasted_iota(jnp.int32, s.shape, 0)
            col = kv_start + jax.lax.broadcasted_iota(jnp.int32, s.shape, 1)
            _online_update(jnp.where(col <= row, s, _NEG_INF))

        @pl.when(jnp.logical_not(is_diagonal))
        def _interior():
            _online_update(s)

    @pl.when(ki == pl.num_programs(2) - 1)
    def _finalize():
        o_ref[...] = (acc_ref[...] *
                      pl.reciprocal(l_ref[...], approx=True)).astype(o_ref.dtype)


def _flash_attention(q, k, v, *, q_blk, kv_blk):
    B, Sp, H = q.shape
    nq = Sp // q_blk
    nkv = Sp // kv_blk

    def kv_index_map(b, qi, ki):
        # Clamp to the last KV tile this Q tile actually needs; skipped steps
        # repeat the previous block index so Pallas elides the re-fetch.
        last_ki = (qi * q_blk + q_blk - 1) // kv_blk
        return (b, jnp.minimum(ki, last_ki), 0)

    grid_spec = pltpu.PrefetchScalarGridSpec(
        num_scalar_prefetch=0,
        grid=(B, nq, nkv),
        in_specs=[
            pl.BlockSpec((None, q_blk, H), lambda b, qi, ki: (b, qi, 0)),
            pl.BlockSpec((None, kv_blk, H), kv_index_map),
            pl.BlockSpec((None, kv_blk, H), kv_index_map),
        ],
        out_specs=pl.BlockSpec((None, q_blk, H), lambda b, qi, ki: (b, qi, 0)),
        scratch_shapes=[
            pltpu.VMEM((q_blk, 1), jnp.float32),    # running max m
            pltpu.VMEM((q_blk, 1), jnp.float32),    # running denom l
            pltpu.VMEM((q_blk, H), jnp.float32),    # output accumulator
        ],
    )
    return pl.pallas_call(
        functools.partial(_flash_attn_kernel, q_blk=q_blk, kv_blk=kv_blk),
        out_shape=jax.ShapeDtypeStruct((B, Sp, H), jnp.float32),
        grid_spec=grid_spec,
        compiler_params=pltpu.CompilerParams(
            dimension_semantics=("parallel", "parallel", "arbitrary"),
            vmem_limit_bytes=32 * 1024 * 1024,
        ),
    )(q, k, v)


def flash_attention_head(x, wq, wk, wv, *, q_block=256, kv_block=512):
    """x: (B, S, E) f32; wq/wk/wv: (E, H) f32. Returns (B, S, H) f32."""
    B, S, E = x.shape
    H = wq.shape[1]
    scale = float(H) ** (-0.5)

    # Tile sizes: q_blk a multiple of 8; kv_blk a multiple of q_blk (so both
    # divide the padded sequence length Sp).
    q_blk = min(q_block, _round_up(S, 8))
    kv_blk = min(kv_block, _round_up(S, q_blk))
    kv_blk = max(q_blk, (kv_blk // q_blk) * q_blk)
    Sp = _round_up(S, kv_blk)

    # Projection row block: as large as possible (<=1024) while dividing Sp.
    row_block = kv_blk
    while row_block * 2 <= 1024 and Sp % (row_block * 2) == 0:
        row_block *= 2

    # Fold 1/sqrt(H) into Wq and fuse into a single (E, 3H) bf16 weight.
    w_qkv = jnp.concatenate([wq * scale, wk, wv], axis=1).astype(jnp.bfloat16)

    x_p = x
    if Sp != S:
        x_p = jnp.pad(x, ((0, 0), (0, Sp - S), (0, 0)))

    q, k, v = _qkv_projection(x_p, w_qkv, H=H, row_block=row_block)
    out = _flash_attention(q, k, v, q_blk=q_blk, kv_blk=kv_blk)
    if Sp != S:
        out = out[:, :S, :]
    return out


def _reference(x, wq, wk, wv):
    q = x @ wq
    k = x @ wk
    v = x @ wv
    scale = k.shape[-1] ** (-0.5)
    s = jnp.einsum("bqd,bkd->bqk", q, k) * scale
    S = x.shape[1]
    mask = jnp.tril(jnp.ones((S, S), dtype=bool))
    s = jnp.where(mask[None, :, :], s, -jnp.inf)
    w = jax.nn.softmax(s, axis=-1)
    return jnp.einsum("bqk,bkd->bqd", w, v)


if __name__ == "__main__":
    # Small shapes consistent with the module's forward.
    batch, seq_len, embed_dim, head_dim = 2, 8, 32, 16

    key = jax.random.PRNGKey(0)
    kx, kq, kk, kv = jax.random.split(key, 4)
    x = jax.random.normal(kx, (batch, seq_len, embed_dim), dtype=jnp.float32)

    # nn.Linear(embed_dim, head_dim, bias=False): weight (H, E), y = x @ W^T.
    bound = 1.0 / math.sqrt(embed_dim)
    wq = jax.random.uniform(kq, (head_dim, embed_dim), jnp.float32, -bound, bound).T
    wk = jax.random.uniform(kk, (head_dim, embed_dim), jnp.float32, -bound, bound).T
    wv = jax.random.uniform(kv, (head_dim, embed_dim), jnp.float32, -bound, bound).T

    out = jax.block_until_ready(flash_attention_head(x, wq, wk, wv))
    ref = _reference(x, wq, wk, wv)
    assert out.shape == (batch, seq_len, head_dim)
    # bf16 MXU operands (f32 accumulate) -> looser tolerance than pure f32.
    assert jnp.allclose(out, ref, atol=5e-2, rtol=5e-2), "mismatch (small)"

    # Second check: padded sequence + diagonal/interior mask split.
    S2, E2 = 320, 64
    k1, k2, k3, k4 = jax.random.split(jax.random.PRNGKey(0), 4)
    x2 = jax.random.normal(k1, (batch, S2, E2), dtype=jnp.float32)
    b2 = 1.0 / math.sqrt(E2)
    wq2 = jax.random.uniform(k2, (head_dim, E2), jnp.float32, -b2, b2).T
    wk2 = jax.random.uniform(k3, (head_dim, E2), jnp.float32, -b2, b2).T
    wv2 = jax.random.uniform(k4, (head_dim, E2), jnp.float32, -b2, b2).T
    out2 = jax.block_until_ready(flash_attention_head(x2, wq2, wk2, wv2))
    ref2 = _reference(x2, wq2, wk2, wv2)
    assert jnp.allclose(out2, ref2, atol=5e-2, rtol=5e-2), "mismatch (tiled)"

    # Third check: multi-KV-tile path (causal KV-tile skipping + DMA clamp +
    # interior unmasked tiles + online-softmax across several KV tiles).
    S3 = 1200
    m1, m2, m3, m4 = jax.random.split(jax.random.PRNGKey(1), 4)
    x3 = jax.random.normal(m1, (batch, S3, E2), dtype=jnp.float32)
    wq3 = jax.random.uniform(m2, (head_dim, E2), jnp.float32, -b2, b2).T
    wk3 = jax.random.uniform(m3, (head_dim, E2), jnp.float32, -b2, b2).T
    wv3 = jax.random.uniform(m4, (head_dim, E2), jnp.float32, -b2, b2).T
    out3 = jax.block_until_ready(flash_attention_head(x3, wq3, wk3, wv3))
    ref3 = _reference(x3, wq3, wk3, wv3)
    assert jnp.allclose(out3, ref3, atol=5e-2, rtol=5e-2), "mismatch (multi-kv)"

    print("KERNEL_OK")
</pallas_src>

<mosaic_0001>
module attributes {stable_mosaic.version = 11 : i64} {
  func.func @_qkv_proj_kernel(%arg0: i32, %arg1: i32, %arg2: memref<1x8x32xf32, #tpu.memory_space<vmem>>, %arg3: memref<32x48xbf16, #tpu.memory_space<vmem>>, %arg4: memref<1x8x16xbf16, #tpu.memory_space<vmem>>, %arg5: memref<1x8x16xbf16, #tpu.memory_space<vmem>>, %arg6: memref<1x8x16xbf16, #tpu.memory_space<vmem>>) attributes {dimension_semantics = [#tpu.dimension_semantics<parallel>, #tpu.dimension_semantics<parallel>], iteration_bounds = array<i64: 2, 1>, scalar_prefetch = 0 : i64, scratch_operands = 0 : i64, tpu.core_type = #tpu.core_type<tc>, window_params = [{transform_indices = @transform_0, window_bounds = array<i64: 1, 8, 32>}, {pipeline_mode = #tpu.pipeline_mode<synchronous>, transform_indices = @transform_1, window_bounds = array<i64: 32, 48>}, {transform_indices = @transform_2, window_bounds = array<i64: 1, 8, 16>}, {transform_indices = @transform_3, window_bounds = array<i64: 1, 8, 16>}, {transform_indices = @transform_4, window_bounds = array<i64: 1, 8, 16>}]} {
    %c0 = arith.constant 0 : index
    %c0_0 = arith.constant 0 : index
    %c0_1 = arith.constant 0 : index
    %0 = vector.load %arg2[%c0, %c0_0, %c0_1] : memref<1x8x32xf32, #tpu.memory_space<vmem>>, vector<1x8x32xf32>
    %1 = vector.shape_cast %0 : vector<1x8x32xf32> to vector<8x32xf32>
    %2 = arith.truncf %1 : vector<8x32xf32> to vector<8x32xbf16>
    %c0_2 = arith.constant 0 : index
    %c0_3 = arith.constant 0 : index
    %3 = vector.load %arg3[%c0_2, %c0_3] : memref<32x48xbf16, #tpu.memory_space<vmem>>, vector<32x48xbf16>
    %cst = arith.constant dense<0.000000e+00> : vector<8x48xf32>
    %4 = tpu.matmul %2, %3, %cst {dimension_numbers = #tpu.dot_dimension_numbers<[1], [0], [0], [1], [0, 0, 1, 1], [], []>} : vector<8x32xbf16>, vector<32x48xbf16>, vector<8x48xf32> -> vector<8x48xf32>
    %5 = vector.extract_strided_slice %4 {offsets = [0, 0], sizes = [8, 16], strides = [1, 1]} : vector<8x48xf32> to vector<8x16xf32>
    %6 = arith.truncf %5 : vector<8x16xf32> to vector<8x16xbf16>
    %c0_4 = arith.constant 0 : index
    %c0_5 = arith.constant 0 : index
    %c0_6 = arith.constant 0 : index
    %7 = vector.load %arg4[%c0_4, %c0_5, %c0_6] : memref<1x8x16xbf16, #tpu.memory_space<vmem>>, vector<1x8x16xbf16>
    %8 = vector.shape_cast %7 : vector<1x8x16xbf16> to vector<8x16xbf16>
    %9 = vector.shape_cast %6 : vector<8x16xbf16> to vector<1x8x16xbf16>
    tpu.vector_store %arg4[%c0_4, %c0_5, %c0_6], %9 {strides = array<i32>} : memref<1x8x16xbf16, #tpu.memory_space<vmem>>, vector<1x8x16xbf16>,
    %10 = vector.extract_strided_slice %4 {offsets = [0, 16], sizes = [8, 16], strides = [1, 1]} : vector<8x48xf32> to vector<8x16xf32>
    %11 = arith.truncf %10 : vector<8x16xf32> to vector<8x16xbf16>
    %c0_7 = arith.constant 0 : index
    %c0_8 = arith.constant 0 : index
    %c0_9 = arith.constant 0 : index
    %12 = vector.load %arg5[%c0_7, %c0_8, %c0_9] : memref<1x8x16xbf16, #tpu.memory_space<vmem>>, vector<1x8x16xbf16>
    %13 = vector.shape_cast %12 : vector<1x8x16xbf16> to vector<8x16xbf16>
    %14 = vector.shape_cast %11 : vector<8x16xbf16> to vector<1x8x16xbf16>
    tpu.vector_store %arg5[%c0_7, %c0_8, %c0_9], %14 {strides = array<i32>} : memref<1x8x16xbf16, #tpu.memory_space<vmem>>, vector<1x8x16xbf16>,
    %15 = vector.extract_strided_slice %4 {offsets = [0, 32], sizes = [8, 16], strides = [1, 1]} : vector<8x48xf32> to vector<8x16xf32>
    %16 = arith.truncf %15 : vector<8x16xf32> to vector<8x16xbf16>
    %c0_10 = arith.constant 0 : index
    %c0_11 = arith.constant 0 : index
    %c0_12 = arith.constant 0 : index
    %17 = vector.load %arg6[%c0_10, %c0_11, %c0_12] : memref<1x8x16xbf16, #tpu.memory_space<vmem>>, vector<1x8x16xbf16>
    %18 = vector.shape_cast %17 : vector<1x8x16xbf16> to vector<8x16xbf16>
    %19 = vector.shape_cast %16 : vector<8x16xbf16> to vector<1x8x16xbf16>
    tpu.vector_store %arg6[%c0_10, %c0_11, %c0_12], %19 {strides = array<i32>} : memref<1x8x16xbf16, #tpu.memory_space<vmem>>, vector<1x8x16xbf16>,
    return
  }
  func.func @transform_0(%arg0: i32, %arg1: i32) -> (i32, i32, i32) {
    %c0_i32 = arith.constant 0 : i32
    %c0_i32_0 = arith.constant 0 : i32
    return %arg0, %arg1, %c0_i32 : i32, i32, i32
  }
  func.func @transform_1(%arg0: i32, %arg1: i32) -> (i32, i32) {
    %c0_i32 = arith.constant 0 : i32
    %c0_i32_0 = arith.constant 0 : i32
    %c0_i32_1 = arith.constant 0 : i32
    return %c0_i32, %c0_i32_0 : i32, i32
  }
  func.func @transform_2(%arg0: i32, %arg1: i32) -> (i32, i32, i32) {
    %c0_i32 = arith.constant 0 : i32
    %c0_i32_0 = arith.constant 0 : i32
    return %arg0, %arg1, %c0_i32 : i32, i32, i32
  }
  func.func @transform_3(%arg0: i32, %arg1: i32) -> (i32, i32, i32) {
    %c0_i32 = arith.constant 0 : i32
    %c0_i32_0 = arith.constant 0 : i32
    return %arg0, %arg1, %c0_i32 : i32, i32, i32
  }
  func.func @transform_4(%arg0: i32, %arg1: i32) -> (i32, i32, i32) {
    %c0_i32 = arith.constant 0 : i32
    %c0_i32_0 = arith.constant 0 : i32
    return %arg0, %arg1, %c0_i32 : i32, i32, i32
  }
}

</mosaic_0001>

<bundles_post_ra>
// kernel: tpu_custom_call.1
= control target key start
LH: loop header
LB: loop body
LE: loop exit
PB: predicated region body
PF: predicated region fallthrough
CT: control target
= control target key end

     0   :  { %s1154_s0 = inlined_call_operand.hbm [shape: f32[2,8,32], index: 0, kind: input, shape index: {}]   ;;  %s1155_s1 = inlined_call_operand.hbm [shape: bf16[32,48], index: 1, kind: input, shape index: {}]   ;;  %s1156_s2 = inlined_call_operand.hbm [shape: bf16[2,8,16], index: 2, kind: output, shape index: {0}]   ;;  %s1157_s3 = inlined_call_operand.hbm [shape: bf16[2,8,16], index: 3, kind: output, shape index: {1}]   ;;  %s1158_s4 = inlined_call_operand.hbm [shape: bf16[2,8,16], index: 4, kind: output, shape index: {2}]  }
   0x1   :  { %1161 = sst [smem:[#allocation15_spill]] %s1155_s1 }
   0x2   :  { %10 = vsyncpa [#allocation3], 0 }
   0x3   :  { %12 = vsyncpa [#allocation3 + $0x1], 0 }
   0x4   :  { %13 = vsyncpa [#allocation6], 0 }
   0x5   :  { %14 = vsyncpa [#allocation4], 0 }
   0x6   :  { %16 = vsyncpa [#allocation4 + $0x1], 0 }
   0x7   :  { %17 = vsyncpa [#allocation9], 0 }
   0x8   :  { %19 = vsyncpa [#allocation9 + $0x1], 0  ;;  %s910_s15 = smov 0   ;;  %s912_s16 = smov 0  }
   0x9   :  { %s914_s17 = smov 0   ;;  %s916_s18 = smov 0  }
   0xa   :  { %s918_s19 = smov 0   ;;  %s920_s20 = smov 0  }
   0xb LB: > { %s941_s21 = sadd.s32 4294967295, %s872_s20   ;;  %s1159_s22 = sadd.s32 4294967294, %s872_s20   ;;  %s872_s20 = sphi %s920_s20, %s25_s20   ;;  %s868_s19 = sphi %s918_s19, %s1180_s19   ;;  %s864_s18 = sphi %s916_s18, %s1179_s18   ;;  %s860_s17 = sphi %s914_s17, %s1178_s17   ;;  %s856_s16 = sphi %s912_s16, %s1177_s16   ;;  %s852_s15 = sphi %s910_s15, %s1176_s15  }
   0xc   : > { %p59_p0 = scmp.ne.s32.totalorder %s856_s16, %s852_s15  ;;  %p1160_p1 = scmp.eq.s32.totalorder %s941_s21, 0 }
   0xd   : > { %p112_p3 = scmp.eq.s32.totalorder %s1159_s22, 1  ;;  %p552_p5 = scmp.ge.s32.totalorder %s872_s20, 1 }
   0xe   : > { %p952_p4 = por %p1160_p1, %p59_p0  ;;  %p175_p7 = scmp.lt.s32.totalorder %s872_s20, 3 }
   0xf   : > { %p957_p6 = por %p112_p3, %p59_p0  ;;  %s874_s26 = smov [#allocation5]  }
  0x10   : > { %p962_p8 = pnand %p552_p5, %p175_p7  ;;  %s187_s27 = sshll.u32 %s874_s26, 4  ;;  %s188_s27 = int_to_ptr.vmem [resolvable:$true] %s187_s27 }
  0x11   : > { %s1163_s24 = scalar_select %p957_p6, 1, 0 }
  0x12   : > { %p599_p9 = pneg %p962_p8  ;;  %s37_s29 = sadd.s32 1, %s868_s19 }
  0x13   : > { %s689_s30 = scalar_lea.vmem %s188_s27, 256  ;;  %p697_p5 = scmp.lt.s32.totalorder %s188_s27, %s188_s27 }
  0x14   : > { %p971_p11 = pnand %p599_p9, %p1160_p1  ;;  %p690_p13 = scmp.ne.s32.totalorder %s188_s27, %s689_s30 }
  0x15   : > { %p698_p7 = scmp.lt.s32.totalorder %s689_s30, %s689_s30 }
  0x16   : > { %p680_p12 = pneg %p971_p11 }
  0x17   : > { %p699_p2 = por %p698_p7, %p697_p5 }
  0x18   : > { %p692_p0 = pnand %p690_p13, %p680_p12 }
  0x1a   : > { %p693_p3 = pneg %p692_p0 }
  0x1c   : > { %p700_p6 = pnand %p699_p2, %p693_p3 }
  0x1e   : > { %703 = shalt.err (!%p700_p6)
}
  0x1f   : > { %s875_s5 = smov 64   ;;  %s876_s6 = smov 4  }
  0x20   : > { %s1166_s1 = sld [smem:[#allocation15_spill]]  ;;  %p39_p2 = scmp.ge.s32.totalorder %s37_s29, 2 }
  0x21   : > { %s46_s9 = sadd.s32 1, %s860_s17  ;;  %p53_p6 = scmp.ne.s32.totalorder %s860_s17, %s856_s16 }
  0x22   : > { %p54_p9 = scmp.eq.s32.totalorder %s872_s20, 0  ;;  %s1182_s29 = smov (%p39_p2, %s37_s29), 0 }
  0x23   : > { %p1168_p13 = scmp.eq.s32.totalorder %s941_s21, 1  ;;  %s41_s12 = ssub.s32 %s868_s19, %s1182_s29 }
  0x24   : > { %p989_p12 = por %p54_p9, %p53_p6  ;;  %p618_p3 = scmp.lt.s32.totalorder %s872_s20, 2 }
  0x25   : > { %p995_p0 = por %p1168_p13, %p53_p6  ;;  %s201_s13 = sand.u32 1, %s860_s17  }
  0x26   : > { %602 = dma.hbm_to_vmem [thread:$0]  (!%p971_p11), %s1166_s1, 256, %s188_s27, [#allocation6], %s875_s5, %s875_s5, %s876_s6  }
  0x27   : > { %p44_p11 = scmp.eq.s32.totalorder %s41_s12, 0  ;;  %s555_s14 = sshll.u32 %s201_s13, 3 }
  0x28   : > { %s556_s27 = sshll.u32 %s868_s19, 7  ;;  %s205_s6 = scalar_lea.vmem [#allocation2], %s555_s14 }
  0x29   : > { %s1004_s26 = scalar_select %p44_p11, %s860_s17, %s46_s9  }
  0x2a   : > { %s211_s5 = scalar_lea.hbm %s1154_s0, %s556_s27  ;;  %s213_s7 = sshll.u32 %s205_s6, 4  ;;  %s214_s7 = int_to_ptr.vmem [resolvable:$true] %s213_s7 }
  0x2b   : > { %p1012_p5 = pnand %p618_p3, %p989_p12  ;;  %s202_s22 = scalar_lea.sflag [#allocation3], %s201_s13 }
  0x2c   : > { %s717_s12 = scalar_lea.vmem %s214_s7, 128  ;;  %s877_s9 = smov [#allocation2]  }
  0x2d   : > { %p706_p7 = pneg %p1012_p5  ;;  %p718_p2 = scmp.ne.s32.totalorder %s214_s7, %s717_s12 }
  0x2e   : > { %s722_s1 = sshll.u32 %s877_s9, 4  ;;  %s723_s1 = int_to_ptr.vmem [resolvable:$false] %s722_s1 }
  0x2f   : > { %p720_p6 = pnand %p718_p2, %p706_p7  ;;  %s724_s27 = scalar_lea.vmem %s723_s1, 256 }
  0x30   : > { %p725_p13 = scmp.lt.s32.totalorder %s214_s7, %s723_s1  ;;  %p726_p11 = scmp.lt.s32.totalorder %s724_s27, %s717_s12 }
  0x31   : > { %p721_p9 = pneg %p720_p6 }
  0x32   : > { %p727_p10 = por %p726_p11, %p725_p13 }
  0x34   : > { %p728_p1 = pnand %p727_p10, %p721_p9 }
  0x36   : > { %731 = shalt.err (!%p728_p1)
}
  0x37   : > { %606 = dma.hbm_to_vmem [thread:$0]  (!%p1012_p5), %s211_s5, 128, %s214_s7, %s202_s22  }
  0x38   : > { %222 = sbr.rel (%p962_p8) target bundleno = 419 (0x1a3), region = 28  ;;  %s1023_s10 = sand.u32 (!%p962_p8), 1, %s856_s16  }
  0x39   : > { %s558_s13 = sshll.u32 (!%p962_p8), %s1023_s10, 3  ;;  %s225_s14 = scalar_lea.sflag (!%p962_p8), [#allocation3], %s1023_s10 }
  0x3a   : > { %s228_s28 = scalar_lea.vmem (!%p962_p8), [#allocation2], %s558_s13 }
  0x3d   : > { %835 = dma.done.wait (%p952_p4), %s225_s14, 128  }
  0x3e   : > { %837 = vsyncadd (%p952_p4), %s225_s14, 4294967168  ;;  %p1171_p1 = scmp.eq.s32.totalorder %s941_s21, 0 }
  0x40   : > { %839 = dma.done.wait (%p1171_p1), [#allocation6], 256   ;;  %p1172_p10 = pmov %p1171_p1 }
  0x41   : > { %v878_v0 = vmov 0.0   ;;  %vm879_vm0 = vmmov 0   ;;  %v676_v1 = vld [vmem:[#allocation5 + $0x8] sm:$0xff]   ;;  %v677_v2 = vld [vmem:[#allocation5] sm:$0xff]   ;;  %v268_v3 = vld [vmem:[%s228_s28] sm:$0xff]  ;;  %vm286_vm1 = vcmask 261120  }
  0x42   : > { %841 = vsyncadd (%p1172_p10), [#allocation6], 4294967040  ;;  %579 = vmatprep.subr.bf16.mxu0 %v878_v0  ;;  %583 = vmatprep.mubr.msk.bf16.mxu0 %vm879_vm0, %v878_v0  ;;  %v269_v4 = vpack.c.bf16 %v268_v3, %v268_v3  ;;  %s1036_s1 = sshll.u32 %s1023_s10, 2  ;;  %s1039_s22 = sshll.u32 %s864_s18, 6  ;;  %vm331_vm2 = vcmask 125952  }
  0x43   : > { %580 = vmatpush3.bf16.msra.mxu0 %v676_v1  ;;  %s252_s23 = scalar_lea.vmem [#allocation7], %s1036_s1  ;;  %s1046_s6 = scalar_lea.hbm %s1156_s2, %s1039_s22 }
  0x44   : > { %581 = vmatprep.subr.bf16.mxu0 %v878_v0  ;;  %s369_s25 = sshll.u32 %s252_s23, 4  ;;  %s880_s18 = smov 112   ;;  %s1048_s25 = int_to_ptr.vmem [resolvable:$true] %s369_s25 }
  0x45   : > { %s345_s7 = scalar_lea.sflag [#allocation4], %s1023_s10  ;;  %s732_s8 = scalar_lea.vmem %s1048_s25, 64 }
  0x46   : > { %p733_p4 = scmp.ne.s32.totalorder %s1048_s25, %s732_s8  ;;  %s881_s12 = smov [#allocation7]  }
  0x47   : > { %582 = vmatpush3.bf16.msra.mxu0 %v677_v2  ;;  %s736_s9 = sshll.u32 %s881_s12, 4  ;;  %s737_s9 = int_to_ptr.vmem [resolvable:$false] %s736_s9 }
  0x48   : > { %p734_p8 = pnand %p733_p4, %p995_p0  ;;  %s738_s27 = scalar_lea.vmem %s737_s9, 128 }
  0x49   : > { %p739_p3 = scmp.lt.s32.totalorder %s1048_s25, %s737_s9  ;;  %p740_p5 = scmp.lt.s32.totalorder %s738_s27, %s732_s8 }
  0x4a   : > { %584 = vmatmul.mubr.msk.bf16.vlgmr.msra.gmra.mxu0 %vm286_vm1, %v269_v4  ;;  %p735_p12 = pneg %p734_p8 }
  0x4b   : > { %p741_p7 = por %p740_p5, %p739_p3 }
  0x4d   : > { %p742_p2 = pnand %p741_p7, %p735_p12 }
 0x10a   : > { %v324_v5 = vpop.f32.mrf.mxu0 }
 0x10b   : > { %v330_v6 = vpack.c.bf16 %v324_v5, %v324_v5 }
 0x10c   : > { %v585_v7 = vpop.f32.mrf.mxu0 }
 0x10d   : > { %336 = vrot.lane.b32.xlu0 %v330_v6, %s880_s18  ;;  %332 = vst.msk [vmem:[%s252_s23] sm:$0xf] %vm331_vm2, %v330_v6 }
 0x10e   : > { %v327_v8 = vpop.f32.mrf.mxu0 }
 0x10f   : > { %745 = shalt.err (!%p742_p2)
}
 0x110   : > { %s746_s13 = scalar_lea.hbm %s1046_s6, 64  ;;  %s750_s28 = scalar_lea.hbm %s1156_s2, 128 }
 0x111   : > { %p747_p6 = scmp.ne.s32.totalorder %s1046_s6, %s746_s13  ;;  %p751_p11 = scmp.lt.s32.totalorder %s1046_s6, %s1156_s2 }
 0x112   : > { %p752_p1 = scmp.lt.s32.totalorder %s750_s28, %s746_s13 }
 0x113   : > { %p748_p9 = pnand %p747_p6, %p995_p0 }
 0x114   : > { %p753_p10 = por %p752_p1, %p751_p11 }
 0x115   : > { %p749_p13 = pneg %p748_p9 }
 0x117   : > { %p754_p4 = pnand %p753_p10, %p749_p13 }
 0x119   : > { %757 = shalt.err (!%p754_p4)
}
 0x11a   : > { %593 = dma.vmem_to_hbm [thread:$0]  (%p995_p0), %s1048_s25, 64, %s1046_s6, %s345_s7   ;;  %v586_v9 = vpop.f32.mrf.mxu0 }
 0x11b   : > { %s882_s5 = smov 96   ;;  %s349_s18 = sand.u32 1, %s941_s21  }
 0x11c   : > { %340 = vrot.lane.b32.xlu0 %v330_v6, %s882_s5  ;;  %s259_s8 = scalar_lea.vmem [#allocation8], %s1036_s1  ;;  %s1078_s13 = scalar_lea.hbm %s1157_s3, %s1039_s22 }
 0x11d   : > { %s383_s12 = sshll.u32 %s259_s8, 4  ;;  %s266_s10 = scalar_lea.vmem [#allocation10], %s1036_s1  ;;  %s1080_s12 = int_to_ptr.vmem [resolvable:$true] %s383_s12 }
 0x11e   : > { %s397_s25 = sshll.u32 %s266_s10, 4  ;;  %s1086_s6 = scalar_lea.sflag [#allocation9], %s349_s18  ;;  %s398_s25 = int_to_ptr.vmem [resolvable:$true] %s397_s25 }
 0x11f   : > { %s758_s21 = scalar_lea.vmem %s1080_s12, 64  ;;  %s883_s7 = smov [#allocation8]  }
 0x120   : > { %p759_p8 = scmp.ne.s32.totalorder %s1080_s12, %s758_s21  ;;  %s762_s14 = sshll.u32 %s883_s7, 4  ;;  %s763_s14 = int_to_ptr.vmem [resolvable:$false] %s762_s14 }
 0x121   : > { %s764_s28 = scalar_lea.vmem %s763_s14, 128  ;;  %p765_p5 = scmp.lt.s32.totalorder %s1080_s12, %s763_s14 }
 0x122   : > { %p760_p12 = pnand %p759_p8, %p995_p0  ;;  %p766_p7 = scmp.lt.s32.totalorder %s764_s28, %s758_s21 }
 0x124   : > { %p761_p3 = pneg %p760_p12  ;;  %p767_p2 = por %p766_p7, %p765_p5 }
 0x126   : > { %p768_p6 = pnand %p767_p2, %p761_p3 }
 0x17f   : > { %v337_v10 = vpop.permute.xlu0 %336 }
 0x180   : > { %339 = vst.msk [vmem:[%s259_s8] sm:$0xf] %vm331_vm2, %v337_v10 }
 0x181   : > { %771 = shalt.err (!%p768_p6)
}
 0x182   : > { %s772_s23 = scalar_lea.hbm %s1078_s13, 64  ;;  %s776_s18 = scalar_lea.hbm %s1157_s3, 128 }
 0x183   : > { %p773_p9 = scmp.ne.s32.totalorder %s1078_s13, %s772_s23  ;;  %p777_p1 = scmp.lt.s32.totalorder %s1078_s13, %s1157_s3 }
 0x184   : > { %p778_p10 = scmp.lt.s32.totalorder %s776_s18, %s772_s23 }
 0x185   : > { %p774_p13 = pnand %p773_p9, %p995_p0 }
 0x186   : > { %p779_p4 = por %p778_p10, %p777_p1 }
 0x187   : > { %p775_p11 = pneg %p774_p13 }
 0x189   : > { %p780_p8 = pnand %p779_p4, %p775_p11 }
 0x18b   : > { %783 = shalt.err (!%p780_p8)
}
 0x18c   : > { %594 = dma.vmem_to_hbm [thread:$0]  (%p995_p0), %s1080_s12, 64, %s1078_s13, %s1086_s6  }
 0x18d   : > { %s395_s7 = scalar_lea.hbm %s1158_s4, %s1039_s22  ;;  %s784_s14 = scalar_lea.vmem %s398_s25, 64 }
 0x18e   : > { %v341_v11 = vpop.permute.xlu0 %340  ;;  %p785_p12 = scmp.ne.s32.totalorder %s398_s25, %s784_s14  ;;  %s884_s28 = smov [#allocation10]  }
 0x18f   : > { %343 = vst.msk [vmem:[%s266_s10] sm:$0xf] %vm331_vm2, %v341_v11  ;;  %s788_s23 = sshll.u32 %s884_s28, 4  ;;  %s789_s23 = int_to_ptr.vmem [resolvable:$false] %s788_s23 }
 0x190   : > { %p786_p3 = pnand %p785_p12, %p995_p0  ;;  %s790_s30 = scalar_lea.vmem %s789_s23, 128 }
 0x191   : > { %p791_p7 = scmp.lt.s32.totalorder %s398_s25, %s789_s23  ;;  %p792_p2 = scmp.lt.s32.totalorder %s790_s30, %s784_s14 }
 0x192   : > { %p787_p5 = pneg %p786_p3 }
 0x193   : > { %p793_p6 = por %p792_p2, %p791_p7 }
 0x195   : > { %p794_p9 = pnand %p793_p6, %p787_p5 }
 0x197   : > { %797 = shalt.err (!%p794_p9)
}
 0x198   : > { %s798_s22 = scalar_lea.hbm %s395_s7, 64  ;;  %s802_s13 = scalar_lea.hbm %s1158_s4, 128 }
 0x199   : > { %p799_p13 = scmp.ne.s32.totalorder %s395_s7, %s798_s22  ;;  %p803_p10 = scmp.lt.s32.totalorder %s395_s7, %s1158_s4 }
 0x19a   : > { %p804_p4 = scmp.lt.s32.totalorder %s802_s13, %s798_s22 }
 0x19b   : > { %p800_p11 = pnand %p799_p13, %p995_p0 }
 0x19c   : > { %p805_p8 = por %p804_p4, %p803_p10 }
 0x19d   : > { %p801_p1 = pneg %p800_p11 }
 0x19f   : > { %p806_p12 = pnand %p805_p8, %p801_p1 }
 0x1a1   : > { %809 = shalt.err (!%p806_p12)
}
 0x1a2   : > { %595 = dma.vmem_to_hbm [thread:$0]  (%p995_p0), %s398_s25, 64, %s395_s7, %s1086_s6  }
 0x1a3 PF: > { %s409_s18 = sand.u32 1, %s852_s15   ;;  %p1173_p3 = scmp.ne.s32.totalorder %s1163_s24, 0 }
 0x1a4   : > { %p1174_p5 = scmp.ge.s32.totalorder %s872_s20, 2  ;;  %s410_s8 = scalar_lea.sflag [#allocation4], %s409_s18 }
 0x1a6   : > { %p608_p7 = pnand %p1174_p5, %p1173_p3 }
 0x1a8   : > { %p609_p2 = pneg %p608_p7 }
 0x1aa   : > { %843 = dma.done.wait (%p609_p2), %s410_s8, 64  }
 0x1ab   : > { %845 = vsyncadd (%p609_p2), %s410_s8, 4294967232  ;;  %s1175_s9 = sadd.s32 4294967294, %s872_s20  }
 0x1ac   : > { %s418_s27 = sand.u32 1, %s1175_s9  }
 0x1ad   : > { %s419_s21 = scalar_lea.sflag [#allocation9], %s418_s27 }
 0x1ae   : > { %847 = dma.done.wait (%p609_p2), %s419_s21, 128  }
 0x1af   : > { %849 = vsyncadd (%p609_p2), %s419_s21, 4294967168  ;;  %s25_s20 = sadd.s32 1, %s872_s20   ;;  %s1176_s15 = smov %s856_s16 }
 0x1b0   : > { %p22_p0 = scmp.ge.s32.totalorder %s25_s20, 4   ;;  %s1177_s16 = smov %s860_s17 }
 0x1b1   : > { %s1178_s17 = smov %s1004_s26  ;;  %s1179_s18 = smov %s868_s19 }
 0x1b2   : > { %s1180_s19 = smov %s1182_s29  ;;  %24 = sbr.rel (!%p22_p0) target bundleno = 11 (0xb), region = 109 }
 0x1b7   :  { %433 = vsyncpa [#allocation3], 1 }
 0x1b8   :  { %435 = vsyncpa [#allocation3 + $0x1], 1 }
 0x1b9   :  { %436 = vsyncpa [#allocation6], 1 }
 0x1ba   :  { %437 = vsyncpa [#allocation4], 1 }
 0x1bb   :  { %439 = vsyncpa [#allocation4 + $0x1], 1 }
 0x1bc   :  { %440 = vsyncpa [#allocation9], 1 }
 0x1bd   :  { %442 = vsyncpa [#allocation9 + $0x1], 1 }

</bundles_post_ra>
